<compile_context>
chip_gen: v6e
topology: v6e:2x2x1
jax: 0.10.0
libtpu: 0.0.40
codegen_flags: <defaults>
</compile_context>

<pallas_src>
import math

import jax
import jax.numpy as jnp
from jax.experimental import pallas as pl
from jax.experimental.pallas import tpu as pltpu


def _embedding_kernel(x_ref, w_ref, pb_ref, o_ref):
    # x_ref : (TB, N)      bf16  batch rows on sublanes, flat time on lanes
    # w_ref : (N, P*E)     bf16  block-diagonal weight (resident in VMEM)
    # pb_ref: (1, P*E)     f32   positional table with Linear bias folded in
    # o_ref : (TB, P*E)    f32   lane-dense output (P*E multiple of 128)
    o_ref[...] = (
        jnp.dot(x_ref[...], w_ref[...], preferred_element_type=jnp.float32)
        + pb_ref[...]
    ).astype(o_ref.dtype)


def _pick_batch_tile(B):
    # Small batch: one step.  Otherwise keep >=2 grid steps (v7x has 2 TCs),
    # blocks a multiple of 8 on the sublane dim, capped at 1024 rows/step so
    # the double-buffered working set stays far below v7x's 64 MiB VMEM.
    if B <= 8:
        return B
    tb = min(1024, (B // 2 // 8) * 8)
    return max(tb, 8)


def make_embedding_layer(n_times, patches_num, embedding_dim, depth=1,
                         compute_dtype=jnp.bfloat16):
    P = patches_num
    E = embedding_dim
    N = n_times * depth
    L = math.ceil(N / P)                     # Linear in_features
    # torch.chunk must produce exactly P chunks for the reference forward to be
    # well-defined (positional table has P rows).
    assert N > (P - 1) * L, "n_times*depth too small for patches_num"

    def prepare_params(W, b, pos):
        """One-time parameter transform (hoisted out of forward):
        block-diagonal weight + bias folded into the positional table."""
        Wt = jnp.transpose(W).astype(jnp.float32)                 # (L, E)
        blocks = jnp.zeros((P, L, P, E), jnp.float32)
        idx = jnp.arange(P)
        blocks = blocks.at[idx, :, idx, :].set(Wt)                # blocks[p,:,p,:] = Wt
        # Drop the rows corresponding to the zero padding of the last patch:
        Wbd = blocks.reshape(P * L, P * E)[:N, :]                 # (N, P*E)
        posb = (pos.astype(jnp.float32)
                + b.astype(jnp.float32)[None, :]).reshape(1, P * E)
        return Wbd.astype(compute_dtype), posb

    @jax.jit
    def forward(x, prepared):
        Wbd, posb = prepared                                      # (N, P*E), (1, P*E)
        B = x.shape[0]
        if x.dtype != compute_dtype:
            # Best perf if the caller already supplies bf16 (halves HBM bytes).
            x = x.astype(compute_dtype)

        TB = _pick_batch_tile(B)
        grid = (pl.cdiv(B, TB),)

        out = pl.pallas_call(
            _embedding_kernel,
            out_shape=jax.ShapeDtypeStruct((B, P * E), jnp.float32),
            grid=grid,
            in_specs=[
                pl.BlockSpec((TB, N), lambda i: (i, 0)),
                pl.BlockSpec((N, P * E), lambda i: (0, 0)),       # resident weight
                pl.BlockSpec((1, P * E), lambda i: (0, 0)),       # resident pos+bias
            ],
            out_specs=pl.BlockSpec((TB, P * E), lambda i: (i, 0)),
            compiler_params=pltpu.CompilerParams(
                dimension_semantics=("parallel",)),
        )(x, Wbd, posb)

        # Dropout = identity (inference).  (B, P*E) row-major == (B, P, E);
        # the module's final .view(B, E, P) is the same raw reinterpretation.
        return out.reshape(B, E, P)

    return prepare_params, forward


if __name__ == "__main__":
    # Small, module-consistent shapes: last patch is shorter and zero-padded.
    B = 2
    n_times = 60
    patches_num = 8
    embedding_dim = 32
    depth = 1
    N = n_times * depth
    L = math.ceil(N / patches_num)           # = 8 (last patch has 4 real elems)

    key = jax.random.PRNGKey(0)
    k0, k1, k2, k3 = jax.random.split(key, 4)
    x = jax.random.normal(k0, (B, N), jnp.float32)
    W = 0.1 * jax.random.normal(k1, (embedding_dim, L), jnp.float32)
    bvec = 0.1 * jax.random.normal(k2, (embedding_dim,), jnp.float32)
    pos = 0.1 * jax.random.normal(k3, (patches_num, embedding_dim), jnp.float32)

    prepare_params, fwd = make_embedding_layer(
        n_times, patches_num, embedding_dim, depth=depth)
    prepared = prepare_params(W, bvec, pos)   # one-time weight transform
    out = fwd(x, prepared)
    jax.block_until_ready(out)

    assert out.shape == (B, embedding_dim, patches_num), out.shape
    assert bool(jnp.all(jnp.isfinite(out)))

    # Pure-JAX reference on the same bf16-rounded inputs (f32 math).
    x_bf = x.astype(jnp.bfloat16).astype(jnp.float32)
    Wt_bf = jnp.transpose(W).astype(jnp.bfloat16).astype(jnp.float32)  # (L, E)
    pad = patches_num * L - N
    xp = jnp.pad(x_bf, ((0, 0), (0, pad))).reshape(B, patches_num, L)
    ref_pe = (jnp.einsum("bpl,le->bpe", xp, Wt_bf)
              + bvec[None, None, :] + pos[None, :, :])
    ref = ref_pe.reshape(B, embedding_dim, patches_num)
    assert bool(jnp.allclose(out, ref, atol=1e-3, rtol=1e-3)), float(
        jnp.max(jnp.abs(out - ref)))

    # Loose check against the full-f32 reference (bf16 rounding of x/W).
    xp32 = jnp.pad(x, ((0, 0), (0, pad))).reshape(B, patches_num, L)
    ref32 = (jnp.einsum("bpl,el->bpe", xp32, W)
             + bvec[None, None, :] + pos[None, :, :]
             ).reshape(B, embedding_dim, patches_num)
    assert bool(jnp.allclose(out, ref32, atol=3e-2, rtol=3e-2))

    print("KERNEL_OK")
</pallas_src>

<mosaic_0001>
module attributes {stable_mosaic.version = 11 : i64} {
  func.func @_embedding_kernel(%arg0: i32, %arg1: memref<2x60xbf16, #tpu.memory_space<vmem>>, %arg2: memref<60x256xbf16, #tpu.memory_space<vmem>>, %arg3: memref<1x256xf32, #tpu.memory_space<vmem>>, %arg4: memref<2x256xf32, #tpu.memory_space<vmem>>) attributes {dimension_semantics = [#tpu.dimension_semantics<parallel>], iteration_bounds = array<i64: 1>, scalar_prefetch = 0 : i64, scratch_operands = 0 : i64, tpu.core_type = #tpu.core_type<tc>, window_params = [{transform_indices = @transform_0, window_bounds = array<i64: 2, 60>}, {pipeline_mode = #tpu.pipeline_mode<synchronous>, transform_indices = @transform_1, window_bounds = array<i64: 60, 256>}, {pipeline_mode = #tpu.pipeline_mode<synchronous>, transform_indices = @transform_2, window_bounds = array<i64: 1, 256>}, {transform_indices = @transform_3, window_bounds = array<i64: 2, 256>}]} {
    %c0 = arith.constant 0 : index
    %c0_0 = arith.constant 0 : index
    %0 = vector.load %arg1[%c0, %c0_0] : memref<2x60xbf16, #tpu.memory_space<vmem>>, vector<2x60xbf16>
    %c0_1 = arith.constant 0 : index
    %c0_2 = arith.constant 0 : index
    %1 = vector.load %arg2[%c0_1, %c0_2] : memref<60x256xbf16, #tpu.memory_space<vmem>>, vector<60x256xbf16>
    %cst = arith.constant dense<0.000000e+00> : vector<2x256xf32>
    %2 = tpu.matmul %0, %1, %cst {dimension_numbers = #tpu.dot_dimension_numbers<[1], [0], [0], [1], [0, 0, 1, 1], [], []>} : vector<2x60xbf16>, vector<60x256xbf16>, vector<2x256xf32> -> vector<2x256xf32>
    %c0_3 = arith.constant 0 : index
    %c0_4 = arith.constant 0 : index
    %3 = vector.load %arg3[%c0_3, %c0_4] : memref<1x256xf32, #tpu.memory_space<vmem>>, vector<1x256xf32>
    %4 = vector.broadcast %3 : vector<1x256xf32> to vector<2x256xf32>
    %5 = arith.addf %2, %4 : vector<2x256xf32>
    %c0_5 = arith.constant 0 : index
    %c0_6 = arith.constant 0 : index
    %6 = vector.load %arg4[%c0_5, %c0_6] : memref<2x256xf32, #tpu.memory_space<vmem>>, vector<2x256xf32>
    tpu.vector_store %arg4[%c0_5, %c0_6], %5 {strides = array<i32>} : memref<2x256xf32, #tpu.memory_space<vmem>>, vector<2x256xf32>,
    return
  }
  func.func @transform_0(%arg0: i32) -> (i32, i32) {
    %c0_i32 = arith.constant 0 : i32
    %c0_i32_0 = arith.constant 0 : i32
    return %arg0, %c0_i32 : i32, i32
  }
  func.func @transform_1(%arg0: i32) -> (i32, i32) {
    %c0_i32 = arith.constant 0 : i32
    %c0_i32_0 = arith.constant 0 : i32
    %c0_i32_1 = arith.constant 0 : i32
    return %c0_i32, %c0_i32_0 : i32, i32
  }
  func.func @transform_2(%arg0: i32) -> (i32, i32) {
    %c0_i32 = arith.constant 0 : i32
    %c0_i32_0 = arith.constant 0 : i32
    %c0_i32_1 = arith.constant 0 : i32
    return %c0_i32, %c0_i32_0 : i32, i32
  }
  func.func @transform_3(%arg0: i32) -> (i32, i32) {
    %c0_i32 = arith.constant 0 : i32
    %c0_i32_0 = arith.constant 0 : i32
    return %arg0, %c0_i32 : i32, i32
  }
}

</mosaic_0001>

<bundles_post_ra>
// kernel: forward.1
= control target key start
LH: loop header
LB: loop body
LE: loop exit
PB: predicated region body
PF: predicated region fallthrough
CT: control target
= control target key end

     0   :  { %8 = vsyncpa [#allocation3], 0  ;;  %s206_s12 = smov [#allocation2]   ;;  %s242_s0 = inlined_call_operand.vmem [shape: bf16[2,60], index: 0, kind: input, shape index: {}]   ;;  %s243_s1 = inlined_call_operand.hbm [shape: bf16[60,256], index: 1, kind: input, shape index: {}]   ;;  %s244_s2 = inlined_call_operand.vmem [shape: f32[1,256], index: 2, kind: input, shape index: {}]   ;;  %s245_s3 = inlined_call_operand.vmem [shape: f32[2,256], index: 3, kind: output, shape index: {}]  }
   0x1   :  { %s16_s13 = sshll.u32 %s206_s12, 4  ;;  %s17_s13 = int_to_ptr.vmem [resolvable:$true] %s16_s13 }
   0x2   :  { %s192_s14 = scalar_lea.vmem %s17_s13, 1024  ;;  %p197_p1 = scmp.lt.s32.totalorder %s17_s13, %s17_s13 }
   0x3   :  { %p193_p0 = scmp.ne.s32.totalorder %s17_s13, %s192_s14  ;;  %p198_p2 = scmp.lt.s32.totalorder %s192_s14, %s192_s14 }
   0x5   :  { %p199_p3 = por %p198_p2, %p197_p1 }
   0x7   :  { %p200_p4 = pnand %p199_p3, %p193_p0 }
   0x9   :  { %203 = shalt.err (!%p200_p4)
}
   0xa   :  { %s207_s15 = smov 128   ;;  %s208_s16 = smov 8  }
   0xb   :  { %22 = dma.hbm_to_vmem [thread:$0]  %s243_s1, 1024, %s17_s13, [#allocation3], %s207_s15, %s207_s15, %s208_s16  }
   0xc   :  { %204 = dma.done.wait [#allocation3], 1024  }
   0xd   :  { %205 = vsyncadd [#allocation3], 4294966272  ;;  %v209_v0 = vmov 0   ;;  %vm92_vm0 = vcmask 1045504   ;;  %v175_v3 = vld [vmem:[#allocation2 + $0x24] ss:$8 sps:$4 sm:$0xff]   ;;  %v40_v11 = vlaneseq }
   0xe   :  { %131 = vmatprep.mubr.bf16.mxu0 %v209_v0  ;;  %v172_v1 = vld [vmem:[#allocation2 + $0x34] ss:$8 sps:$4 sm:$0x3f]   ;;  %v174_v2 = vld [vmem:[#allocation2 + $0x30] ss:$8 sps:$4 sm:$0x3f]  }
   0xf   :  { %165 = vmatprep.subr.msk.bf16.mxu0 %vm92_vm0, %v172_v1  ;;  %v94_v4 = vsel %vm92_vm0, %v174_v2, 0  ;;  %v177_v5 = vld [vmem:[#allocation2 + $0x20] ss:$8 sps:$4 sm:$0xff]   ;;  %v178_v6 = vld [vmem:[#allocation2 + $0x14] ss:$8 sps:$4 sm:$0xff]   ;;  %vm88_vm1 = vcmask 490496  }
  0x10   :  { %108 = vmatpush1.bf16.msra.mxu0 %v94_v4  ;;  %v180_v7 = vld [vmem:[#allocation2 + $0x10] ss:$8 sps:$4 sm:$0xff]   ;;  %v181_v8 = vld [vmem:[#allocation2 + $0x4] ss:$8 sps:$4 sm:$0xff]   ;;  %v183_v9 = vld [vmem:[#allocation2] ss:$8 sps:$4 sm:$0xff]  }
  0x11   :  { %109 = vmatprep.subr.bf16.mxu0 %v175_v3  ;;  %v29_v10 = vld [vmem:[%s242_s0] sm:$0x1]  ;;  %v41_v12 = vshrl.u32 %v40_v11, 7 }
  0x12   :  { %v38_v15 = vld [vmem:[%s244_s2] sm:$0x3] }
  0x13   :  { %v42_v13 = vsub.s32 0, %v41_v12  ;;  %v46_v14 = vsub.s32 1, %v41_v12 }
  0x14   :  { %110 = vmatpush1.bf16.msra.mxu0 %v177_v5 }
  0x15   :  { %111 = vmatprep.subr.bf16.mxu0 %v178_v6  ;;  %v43_v16 = vrot.slane %v38_v15, %v42_v13  ;;  %v47_v17 = vrot.slane %v38_v15, %v46_v14 }
  0x18   :  { %112 = vmatpush1.bf16.msra.mxu0 %v180_v7 }
  0x19   :  { %113 = vmatprep.subr.bf16.mxu0 %v181_v8 }
  0x1c   :  { %114 = vmatpush1.bf16.msra.mxu0 %v183_v9 }
  0x1f   :  { %166 = vmatmul.mubr.msk.bf16.vlgmr.msra.gmra.mxu0 %vm88_vm1, %v29_v10 }
  0xdf   :  { %v133_v18 = vpop.f32.mrf.mxu0 }
  0xe0   :  { %v134_v20 = vadd.f32 %v133_v18, %v43_v16 }
  0xe1   :  { %v135_v19 = vpop.f32.mrf.mxu0 }
  0xe2   :  { %v136_v21 = vadd.f32 %v135_v19, %v47_v17 }
  0xe3   :  { %v137_v22 = vpop.f32.mrf.mxu0 }
  0xe4   :  { %v142_v23 = vcombine.low %v134_v20, %v136_v21 }
  0xe5   :  { %v138_v24 = vpop.f32.mrf.mxu0 }
  0xe6   :  { %167 = vst.sshfl [vmem:[%s245_s3] sm:$0x33 pattern:$0x76325410] %v142_v23 }
  0xe7   :  { %156 = vsyncpa [#allocation3], 1 }

</bundles_post_ra>
